<compile_context>
chip_gen: v6e
topology: v6e:2x2x1
jax: 0.10.0
libtpu: 0.0.40
codegen_flags: <defaults>
</compile_context>

<pallas_src>
import functools

import jax
import jax.numpy as jnp
from jax.experimental import pallas as pl
from jax.experimental.pallas import tpu as pltpu

NEG_SLOPE = 0.01      # PyTorch F.leaky_relu default negative_slope
_FMA_K_MAX = 4        # contraction dims this small go to the VPU, not the MXU
_LANE = 128
_SUBLANE = 8
_MAX_TB = 1024        # batch tile (rows); >=512 is ~85% of HBM roofline, 1024 ~86%


def _round_up(n, m):
    return ((n + m - 1) // m) * m


def _leaky_relu(x):
    return jnp.maximum(x, NEG_SLOPE * x)


def conditioner_kernel(x_ref, w_in_ref, b_in_ref, w_h_ref, b_h_ref,
                       w_out_ref, b_out_ref, shift_ref, lscale_ref,
                       *, num_layers, in_dim, out_dim):
    x = x_ref[...]
    if in_dim <= _FMA_K_MAX:
        # (TB, K) @ (K, Hp) with tiny K: broadcast FMAs on the VPU (skip MXU push/pop).
        acc = x[:, 0:1] * w_in_ref[0:1, :]
        for k in range(1, in_dim):
            acc = acc + x[:, k:k + 1] * w_in_ref[k:k + 1, :]
        h = acc + b_in_ref[...]
    else:
        h = jnp.dot(x.astype(w_in_ref.dtype), w_in_ref[...],
                    preferred_element_type=jnp.float32) + b_in_ref[...]
    h = _leaky_relu(h)

    # Hidden layers (static unroll; num_layers is a trace-time constant).
    # Matmul operands bf16 (MXU), bias + activation f32 (VPU).
    for l in range(num_layers):
        h = jnp.dot(h.astype(w_h_ref.dtype), w_h_ref[l],
                    preferred_element_type=jnp.float32) + b_h_ref[l]
        h = _leaky_relu(h)

    # Output layer: (TB, Hp) @ (Hp, n_out) + (1, n_out), n_out = 2*out_dim (narrow,
    # no lane padding -> minimal HBM writeback). chunk(2, -1) fused into the stores.
    y = jnp.dot(h.astype(w_out_ref.dtype), w_out_ref[...],
                preferred_element_type=jnp.float32) + b_out_ref[...]
    shift_ref[...] = y[:, :out_dim].astype(shift_ref.dtype)
    lscale_ref[...] = y[:, out_dim:].astype(lscale_ref.dtype)


def init_params(key, in_dim, out_dim, hidden_dim, num_layers):
    ks = jax.random.split(key, 6)
    scale = 0.1
    w_in = scale * jax.random.normal(ks[0], (in_dim, hidden_dim), jnp.float32)
    b_in = scale * jax.random.normal(ks[1], (1, hidden_dim), jnp.float32)
    w_h = scale * jax.random.normal(ks[2], (num_layers, hidden_dim, hidden_dim), jnp.float32)
    b_h = scale * jax.random.normal(ks[3], (num_layers, 1, hidden_dim), jnp.float32)
    w_out = scale * jax.random.normal(ks[4], (hidden_dim, out_dim * 2), jnp.float32)
    b_out = scale * jax.random.normal(ks[5], (1, out_dim * 2), jnp.float32)
    return dict(w_in=w_in, b_in=b_in, w_h=w_h, b_h=b_h, w_out=w_out, b_out=b_out)


def prepare_params(params, *, use_bf16=True):
    """Pad hidden feature dims to full 128-lane tiles and pre-cast matmul weights to
    bf16. Call once per parameter set and reuse across forward calls (hoists the
    pad/cast copies out of the per-step path). Zero padding is exact: padded lanes
    stay zero through bias + leaky_relu and contribute 0 to every contraction."""
    in_dim, hidden = params["w_in"].shape
    num_layers = params["w_h"].shape[0]
    n_out = params["w_out"].shape[1]
    hp = _round_up(hidden, _LANE)
    mm_dtype = jnp.bfloat16 if use_bf16 else jnp.float32

    w_in = jnp.pad(params["w_in"], ((0, 0), (0, hp - hidden)))
    if in_dim > _FMA_K_MAX:          # input layer runs on the MXU -> bf16 operands
        w_in = w_in.astype(mm_dtype)  # (FMA path keeps f32 on the VPU)
    b_in = jnp.pad(params["b_in"], ((0, 0), (0, hp - hidden)))
    w_h = jnp.pad(params["w_h"],
                  ((0, 0), (0, hp - hidden), (0, hp - hidden))).astype(mm_dtype)
    b_h = jnp.pad(params["b_h"], ((0, 0), (0, 0), (0, hp - hidden)))
    w_out = jnp.pad(params["w_out"], ((0, hp - hidden), (0, 0))).astype(mm_dtype)
    b_out = params["b_out"]
    return dict(w_in=w_in, b_in=b_in, w_h=w_h, b_h=b_h, w_out=w_out, b_out=b_out,
                in_dim=in_dim, hp=hp, num_layers=num_layers, n_out=n_out)


def conditioner_forward(x, prepped):
    batch, in_dim = x.shape
    assert in_dim == prepped["in_dim"]
    hp = prepped["hp"]
    num_layers = prepped["num_layers"]
    n_out = prepped["n_out"]
    out_dim = n_out // 2

    # Batch tiling: sublane-aligned; partial edge block is masked by Pallas (rows are
    # independent, so no batch padding / output slicing is needed). Ensure >=2 grid
    # steps when the batch allows it so v7x's 2 TensorCores both get work.
    tb = min(_MAX_TB, _round_up(batch, _SUBLANE))
    if batch > _SUBLANE and pl.cdiv(batch, tb) < 2:
        tb = _round_up(pl.cdiv(batch, 2), _SUBLANE)
    grid = (pl.cdiv(batch, tb),)

    w_in, b_in = prepped["w_in"], prepped["b_in"]
    w_h, b_h = prepped["w_h"], prepped["b_h"]
    w_out, b_out = prepped["w_out"], prepped["b_out"]

    # VMEM budget: weights (assume worst-case double buffering) + activation tiles +
    # headroom, clamped to the chip's capacity (v7x only has 64 MiB).
    weight_bytes = sum(int(a.size) * a.dtype.itemsize
                       for a in (w_in, b_in, w_h, b_h, w_out, b_out))
    act_bytes = tb * (in_dim + 4 * hp + 2 * n_out) * 4
    try:
        vmem_cap = pltpu.get_tpu_info().vmem_capacity_bytes
    except Exception:
        vmem_cap = 64 << 20
    vmem_limit = int(min(max(2 * weight_bytes + 2 * act_bytes + (8 << 20), 32 << 20),
                         int(0.9 * vmem_cap)))

    kernel = functools.partial(conditioner_kernel, num_layers=num_layers,
                               in_dim=in_dim, out_dim=out_dim)
    out_shape = (jax.ShapeDtypeStruct((batch, out_dim), jnp.float32),
                 jax.ShapeDtypeStruct((batch, out_dim), jnp.float32))
    compiler_params = pltpu.CompilerParams(dimension_semantics=("parallel",),
                                           vmem_limit_bytes=vmem_limit)

    def _run(weight_mode):
        # Weights/biases use constant index_maps -> VMEM-resident across grid steps;
        # single-buffer them when supported (double-buffering a constant block is waste).
        def wspec(shape, imap):
            if weight_mode is None:
                return pl.BlockSpec(shape, imap)
            return pl.BlockSpec(shape, imap, pipeline_mode=weight_mode)

        const2 = lambda i: (0, 0)
        const3 = lambda i: (0, 0, 0)
        return pl.pallas_call(
            kernel,
            out_shape=out_shape,
            grid=grid,
            in_specs=[
                pl.BlockSpec((tb, in_dim), lambda i: (i, 0)),
                wspec((in_dim, hp), const2),
                wspec((1, hp), const2),
                wspec((num_layers, hp, hp), const3),
                wspec((num_layers, 1, hp), const3),
                wspec((hp, n_out), const2),
                wspec((1, n_out), const2),
            ],
            out_specs=(pl.BlockSpec((tb, out_dim), lambda i: (i, 0)),
                       pl.BlockSpec((tb, out_dim), lambda i: (i, 0))),
            compiler_params=compiler_params,
        )(x, w_in, b_in, w_h, b_h, w_out, b_out)

    try:
        shift, log_scale = _run(pl.Buffered(1))
    except Exception:
        # pipeline_mode=Buffered(1) unsupported on this jax build -> default buffering.
        shift, log_scale = _run(None)
    return shift, log_scale


def conditioner_ref(x, params, *, out_dim, num_layers):
    h = _leaky_relu(x @ params["w_in"] + params["b_in"])
    for l in range(num_layers):
        h = _leaky_relu(h @ params["w_h"][l] + params["b_h"][l])
    y = h @ params["w_out"] + params["b_out"]
    return y[:, :out_dim], y[:, out_dim:]


if __name__ == "__main__":
    # Iris coupling-flow conditioner: condition on 2 dims, transform the other 2.
    batch, in_dim, out_dim, hidden_dim, num_layers = 8, 2, 2, 32, 2

    key = jax.random.PRNGKey(0)
    k_x, k_p = jax.random.split(key)
    x = jax.random.normal(k_x, (batch, in_dim), jnp.float32)
    params = init_params(k_p, in_dim, out_dim, hidden_dim, num_layers)

    # Pad + bf16-cast weights once (hoisted out of the per-call path).
    prepped = prepare_params(params, use_bf16=True)

    shift, log_scale = conditioner_forward(x, prepped)
    shift, log_scale = jax.block_until_ready((shift, log_scale))

    shift_ref, log_scale_ref = conditioner_ref(x, params, out_dim=out_dim,
                                               num_layers=num_layers)
    assert shift.shape == (batch, out_dim) and log_scale.shape == (batch, out_dim)
    # bf16 matmul operands vs f32 reference -> loosened tolerance (use
    # prepare_params(use_bf16=False) for bit-tighter f32 numerics).
    assert jnp.allclose(shift, shift_ref, atol=1e-2, rtol=1e-2)
    assert jnp.allclose(log_scale, log_scale_ref, atol=1e-2, rtol=1e-2)

    # TODO(synk): when this conditioner runs inside a full coupling flow, fuse all
    # coupling layers + the affine transform into one pallas_call (stack per-layer
    # weights along a grid axis) so the hidden slabs never leave VMEM and MXU
    # occupancy / launch cost amortize across layers.
    print("KERNEL_OK")
</pallas_src>

<mosaic_0001>
module attributes {stable_mosaic.version = 11 : i64} {
  func.func @conditioner_kernel(%arg0: i32, %arg1: memref<8x2xf32, #tpu.memory_space<vmem>>, %arg2: memref<2x128xf32, #tpu.memory_space<vmem>>, %arg3: memref<1x128xf32, #tpu.memory_space<vmem>>, %arg4: memref<2x128x128xbf16, #tpu.memory_space<vmem>>, %arg5: memref<2x1x128xf32, #tpu.memory_space<vmem>>, %arg6: memref<128x4xbf16, #tpu.memory_space<vmem>>, %arg7: memref<1x4xf32, #tpu.memory_space<vmem>>, %arg8: memref<8x2xf32, #tpu.memory_space<vmem>>, %arg9: memref<8x2xf32, #tpu.memory_space<vmem>>) attributes {dimension_semantics = [#tpu.dimension_semantics<parallel>], iteration_bounds = array<i64: 1>, scalar_prefetch = 0 : i64, scratch_operands = 0 : i64, tpu.core_type = #tpu.core_type<tc>, window_params = [{transform_indices = @transform_0, window_bounds = array<i64: 8, 2>}, {pipeline_mode = #tpu.pipeline_mode<synchronous>, transform_indices = @transform_1, window_bounds = array<i64: 2, 128>}, {pipeline_mode = #tpu.pipeline_mode<synchronous>, transform_indices = @transform_2, window_bounds = array<i64: 1, 128>}, {pipeline_mode = #tpu.pipeline_mode<synchronous>, transform_indices = @transform_3, window_bounds = array<i64: 2, 128, 128>}, {pipeline_mode = #tpu.pipeline_mode<synchronous>, transform_indices = @transform_4, window_bounds = array<i64: 2, 1, 128>}, {pipeline_mode = #tpu.pipeline_mode<synchronous>, transform_indices = @transform_5, window_bounds = array<i64: 128, 4>}, {pipeline_mode = #tpu.pipeline_mode<synchronous>, transform_indices = @transform_6, window_bounds = array<i64: 1, 4>}, {transform_indices = @transform_7, window_bounds = array<i64: 8, 2>}, {transform_indices = @transform_8, window_bounds = array<i64: 8, 2>}]} {
    %c0 = arith.constant 0 : index
    %c0_0 = arith.constant 0 : index
    %0 = vector.load %arg1[%c0, %c0_0] : memref<8x2xf32, #tpu.memory_space<vmem>>, vector<8x2xf32>
    %1 = vector.extract_strided_slice %0 {offsets = [0, 0], sizes = [8, 1], strides = [1, 1]} : vector<8x2xf32> to vector<8x1xf32>
    %c0_1 = arith.constant 0 : index
    %c0_2 = arith.constant 0 : index
    %2 = vector.load %arg2[%c0_1, %c0_2] : memref<2x128xf32, #tpu.memory_space<vmem>>, vector<1x128xf32>
    %3 = vector.broadcast %1 : vector<8x1xf32> to vector<8x128xf32>
    %4 = vector.broadcast %2 : vector<1x128xf32> to vector<8x128xf32>
    %5 = arith.mulf %3, %4 : vector<8x128xf32>
    %6 = vector.extract_strided_slice %0 {offsets = [0, 1], sizes = [8, 1], strides = [1, 1]} : vector<8x2xf32> to vector<8x1xf32>
    %c1 = arith.constant 1 : index
    %c0_3 = arith.constant 0 : index
    %7 = vector.load %arg2[%c1, %c0_3] : memref<2x128xf32, #tpu.memory_space<vmem>>, vector<1x128xf32>
    %8 = vector.broadcast %6 : vector<8x1xf32> to vector<8x128xf32>
    %9 = vector.broadcast %7 : vector<1x128xf32> to vector<8x128xf32>
    %10 = arith.mulf %8, %9 : vector<8x128xf32>
    %11 = arith.addf %5, %10 : vector<8x128xf32>
    %c0_4 = arith.constant 0 : index
    %c0_5 = arith.constant 0 : index
    %12 = vector.load %arg3[%c0_4, %c0_5] : memref<1x128xf32, #tpu.memory_space<vmem>>, vector<1x128xf32>
    %13 = vector.broadcast %12 : vector<1x128xf32> to vector<8x128xf32>
    %14 = arith.addf %11, %13 : vector<8x128xf32>
    %cst = arith.constant 0.00999999977 : f32
    %15 = vector.broadcast %cst : f32 to vector<8x128xf32>
    %16 = arith.mulf %15, %14 : vector<8x128xf32>
    %17 = arith.maximumf %14, %16 : vector<8x128xf32>
    %18 = arith.truncf %17 : vector<8x128xf32> to vector<8x128xbf16>
    %c0_6 = arith.constant 0 : index
    %c0_7 = arith.constant 0 : index
    %c0_8 = arith.constant 0 : index
    %19 = vector.load %arg4[%c0_6, %c0_7, %c0_8] : memref<2x128x128xbf16, #tpu.memory_space<vmem>>, vector<1x128x128xbf16>
    %20 = vector.shape_cast %19 : vector<1x128x128xbf16> to vector<128x128xbf16>
    %cst_9 = arith.constant dense<0.000000e+00> : vector<8x128xf32>
    %21 = tpu.matmul %18, %20, %cst_9 {dimension_numbers = #tpu.dot_dimension_numbers<[1], [0], [0], [1], [0, 0, 1, 1], [], []>} : vector<8x128xbf16>, vector<128x128xbf16>, vector<8x128xf32> -> vector<8x128xf32>
    %c0_10 = arith.constant 0 : index
    %c0_11 = arith.constant 0 : index
    %c0_12 = arith.constant 0 : index
    %22 = vector.load %arg5[%c0_10, %c0_11, %c0_12] : memref<2x1x128xf32, #tpu.memory_space<vmem>>, vector<1x1x128xf32>
    %23 = vector.shape_cast %22 : vector<1x1x128xf32> to vector<1x128xf32>
    %24 = vector.broadcast %23 : vector<1x128xf32> to vector<8x128xf32>
    %25 = arith.addf %21, %24 : vector<8x128xf32>
    %cst_13 = arith.constant 0.00999999977 : f32
    %26 = vector.broadcast %cst_13 : f32 to vector<8x128xf32>
    %27 = arith.mulf %26, %25 : vector<8x128xf32>
    %28 = arith.maximumf %25, %27 : vector<8x128xf32>
    %29 = arith.truncf %28 : vector<8x128xf32> to vector<8x128xbf16>
    %c1_14 = arith.constant 1 : index
    %c0_15 = arith.constant 0 : index
    %c0_16 = arith.constant 0 : index
    %30 = vector.load %arg4[%c1_14, %c0_15, %c0_16] : memref<2x128x128xbf16, #tpu.memory_space<vmem>>, vector<1x128x128xbf16>
    %31 = vector.shape_cast %30 : vector<1x128x128xbf16> to vector<128x128xbf16>
    %cst_17 = arith.constant dense<0.000000e+00> : vector<8x128xf32>
    %32 = tpu.matmul %29, %31, %cst_17 {dimension_numbers = #tpu.dot_dimension_numbers<[1], [0], [0], [1], [0, 0, 1, 1], [], []>} : vector<8x128xbf16>, vector<128x128xbf16>, vector<8x128xf32> -> vector<8x128xf32>
    %c1_18 = arith.constant 1 : index
    %c0_19 = arith.constant 0 : index
    %c0_20 = arith.constant 0 : index
    %33 = vector.load %arg5[%c1_18, %c0_19, %c0_20] : memref<2x1x128xf32, #tpu.memory_space<vmem>>, vector<1x1x128xf32>
    %34 = vector.shape_cast %33 : vector<1x1x128xf32> to vector<1x128xf32>
    %35 = vector.broadcast %34 : vector<1x128xf32> to vector<8x128xf32>
    %36 = arith.addf %32, %35 : vector<8x128xf32>
    %cst_21 = arith.constant 0.00999999977 : f32
    %37 = vector.broadcast %cst_21 : f32 to vector<8x128xf32>
    %38 = arith.mulf %37, %36 : vector<8x128xf32>
    %39 = arith.maximumf %36, %38 : vector<8x128xf32>
    %40 = arith.truncf %39 : vector<8x128xf32> to vector<8x128xbf16>
    %c0_22 = arith.constant 0 : index
    %c0_23 = arith.constant 0 : index
    %41 = vector.load %arg6[%c0_22, %c0_23] : memref<128x4xbf16, #tpu.memory_space<vmem>>, vector<128x4xbf16>
    %cst_24 = arith.constant dense<0.000000e+00> : vector<8x4xf32>
    %42 = tpu.matmul %40, %41, %cst_24 {dimension_numbers = #tpu.dot_dimension_numbers<[1], [0], [0], [1], [0, 0, 1, 1], [], []>} : vector<8x128xbf16>, vector<128x4xbf16>, vector<8x4xf32> -> vector<8x4xf32>
    %c0_25 = arith.constant 0 : index
    %c0_26 = arith.constant 0 : index
    %43 = vector.load %arg7[%c0_25, %c0_26] : memref<1x4xf32, #tpu.memory_space<vmem>>, vector<1x4xf32>
    %44 = vector.broadcast %43 : vector<1x4xf32> to vector<8x4xf32>
    %45 = arith.addf %42, %44 : vector<8x4xf32>
    %46 = vector.extract_strided_slice %45 {offsets = [0, 0], sizes = [8, 2], strides = [1, 1]} : vector<8x4xf32> to vector<8x2xf32>
    %c0_27 = arith.constant 0 : index
    %c0_28 = arith.constant 0 : index
    %47 = vector.load %arg8[%c0_27, %c0_28] : memref<8x2xf32, #tpu.memory_space<vmem>>, vector<8x2xf32>
    tpu.vector_store %arg8[%c0_27, %c0_28], %46 {strides = array<i32>} : memref<8x2xf32, #tpu.memory_space<vmem>>, vector<8x2xf32>,
    %48 = vector.extract_strided_slice %45 {offsets = [0, 2], sizes = [8, 2], strides = [1, 1]} : vector<8x4xf32> to vector<8x2xf32>
    %c0_29 = arith.constant 0 : index
    %c0_30 = arith.constant 0 : index
    %49 = vector.load %arg9[%c0_29, %c0_30] : memref<8x2xf32, #tpu.memory_space<vmem>>, vector<8x2xf32>
    tpu.vector_store %arg9[%c0_29, %c0_30], %48 {strides = array<i32>} : memref<8x2xf32, #tpu.memory_space<vmem>>, vector<8x2xf32>,
    return
  }
  func.func @transform_0(%arg0: i32) -> (i32, i32) {
    %c0_i32 = arith.constant 0 : i32
    %c0_i32_0 = arith.constant 0 : i32
    return %arg0, %c0_i32 : i32, i32
  }
  func.func @transform_1(%arg0: i32) -> (i32, i32) {
    %c0_i32 = arith.constant 0 : i32
    %c0_i32_0 = arith.constant 0 : i32
    %c0_i32_1 = arith.constant 0 : i32
    return %c0_i32, %c0_i32_0 : i32, i32
  }
  func.func @transform_2(%arg0: i32) -> (i32, i32) {
    %c0_i32 = arith.constant 0 : i32
    %c0_i32_0 = arith.constant 0 : i32
    %c0_i32_1 = arith.constant 0 : i32
    return %c0_i32, %c0_i32_0 : i32, i32
  }
  func.func @transform_3(%arg0: i32) -> (i32, i32, i32) {
    %c0_i32 = arith.constant 0 : i32
    %c0_i32_0 = arith.constant 0 : i32
    %c0_i32_1 = arith.constant 0 : i32
    %c0_i32_2 = arith.constant 0 : i32
    return %c0_i32, %c0_i32_0, %c0_i32_1 : i32, i32, i32
  }
  func.func @transform_4(%arg0: i32) -> (i32, i32, i32) {
    %c0_i32 = arith.constant 0 : i32
    %c0_i32_0 = arith.constant 0 : i32
    %c0_i32_1 = arith.constant 0 : i32
    %c0_i32_2 = arith.constant 0 : i32
    return %c0_i32, %c0_i32_0, %c0_i32_1 : i32, i32, i32
  }
  func.func @transform_5(%arg0: i32) -> (i32, i32) {
    %c0_i32 = arith.constant 0 : i32
    %c0_i32_0 = arith.constant 0 : i32
    %c0_i32_1 = arith.constant 0 : i32
    return %c0_i32, %c0_i32_0 : i32, i32
  }
  func.func @transform_6(%arg0: i32) -> (i32, i32) {
    %c0_i32 = arith.constant 0 : i32
    %c0_i32_0 = arith.constant 0 : i32
    %c0_i32_1 = arith.constant 0 : i32
    return %c0_i32, %c0_i32_0 : i32, i32
  }
  func.func @transform_7(%arg0: i32) -> (i32, i32) {
    %c0_i32 = arith.constant 0 : i32
    %c0_i32_0 = arith.constant 0 : i32
    return %arg0, %c0_i32 : i32, i32
  }
  func.func @transform_8(%arg0: i32) -> (i32, i32) {
    %c0_i32 = arith.constant 0 : i32
    %c0_i32_0 = arith.constant 0 : i32
    return %arg0, %c0_i32 : i32, i32
  }
}

module attributes {stable_mosaic.version = 11 : i64} {
  func.func @conditioner_kernel(%arg0: i32, %arg1: memref<8x2xf32, #tpu.memory_space<vmem>>, %arg2: memref<2x128xf32, #tpu.memory_space<vmem>>, %arg3: memref<1x128xf32, #tpu.memory_space<vmem>>, %arg4: memref<2x128x128xbf16, #tpu.memory_space<vmem>>, %arg5: memref<2x1x128xf32, #tpu.memory_space<vmem>>, %arg6: memref<128x4xbf16, #tpu.memory_space<vmem>>, %arg7: memref<1x4xf32, #tpu.memory_space<vmem>>, %arg8: memref<8x2xf32, #tpu.memory_space<vmem>>, %arg9: memref<8x2xf32, #tpu.memory_space<vmem>>) attributes {dimension_semantics = [#tpu.dimension_semantics<parallel>], iteration_bounds = array<i64: 1>, scalar_prefetch = 0 : i64, scratch_operands = 0 : i64, tpu.core_type = #tpu.core_type<tc>, window_params = [{transform_indices = @transform_0, window_bounds = array<i64: 8, 2>}, {pipeline_mode = #tpu.pipeline_mode<synchronous>, transform_indices = @transform_1, window_bounds = array<i64: 2, 128>}, {pipeline_mode = #tpu.pipeline_mode<synchronous>, transform_indices = @transform_2, window_bounds = array<i64: 1, 128>}, {pipeline_mode = #tpu.pipeline_mode<synchronous>, transform_indices = @transform_3, window_bounds = array<i64: 2, 128, 128>}, {pipeline_mode = #tpu.pipeline_mode<synchronous>, transform_indices = @transform_4, window_bounds = array<i64: 2, 1, 128>}, {pipeline_mode = #tpu.pipeline_mode<synchronous>, transform_indices = @transform_5, window_bounds = array<i64: 128, 4>}, {pipeline_mode = #tpu.pipeline_mode<synchronous>, transform_indices = @transform_6, window_bounds = array<i64: 1, 4>}, {transform_indices = @transform_7, window_bounds = array<i64: 8, 2>}, {transform_indices = @transform_8, window_bounds = array<i64: 8, 2>}]} {
    %c0 = arith.constant 0 : index
    %c0_0 = arith.constant 0 : index
    %0 = vector.load %arg1[%c0, %c0_0] : memref<8x2xf32, #tpu.memory_space<vmem>>, vector<8x2xf32>
    %1 = vector.extract_strided_slice %0 {offsets = [0, 0], sizes = [8, 1], strides = [1, 1]} : vector<8x2xf32> to vector<8x1xf32>
    %c0_1 = arith.constant 0 : index
    %c0_2 = arith.constant 0 : index
    %2 = vector.load %arg2[%c0_1, %c0_2] : memref<2x128xf32, #tpu.memory_space<vmem>>, vector<1x128xf32>
    %3 = vector.broadcast %1 : vector<8x1xf32> to vector<8x128xf32>
    %4 = vector.broadcast %2 : vector<1x128xf32> to vector<8x128xf32>
    %5 = arith.mulf %3, %4 : vector<8x128xf32>
    %6 = vector.extract_strided_slice %0 {offsets = [0, 1], sizes = [8, 1], strides = [1, 1]} : vector<8x2xf32> to vector<8x1xf32>
    %c1 = arith.constant 1 : index
    %c0_3 = arith.constant 0 : index
    %7 = vector.load %arg2[%c1, %c0_3] : memref<2x128xf32, #tpu.memory_space<vmem>>, vector<1x128xf32>
    %8 = vector.broadcast %6 : vector<8x1xf32> to vector<8x128xf32>
    %9 = vector.broadcast %7 : vector<1x128xf32> to vector<8x128xf32>
    %10 = arith.mulf %8, %9 : vector<8x128xf32>
    %11 = arith.addf %5, %10 : vector<8x128xf32>
    %c0_4 = arith.constant 0 : index
    %c0_5 = arith.constant 0 : index
    %12 = vector.load %arg3[%c0_4, %c0_5] : memref<1x128xf32, #tpu.memory_space<vmem>>, vector<1x128xf32>
    %13 = vector.broadcast %12 : vector<1x128xf32> to vector<8x128xf32>
    %14 = arith.addf %11, %13 : vector<8x128xf32>
    %cst = arith.constant 0.00999999977 : f32
    %15 = vector.broadcast %cst : f32 to vector<8x128xf32>
    %16 = arith.mulf %15, %14 : vector<8x128xf32>
    %17 = arith.maximumf %14, %16 : vector<8x128xf32>
    %18 = arith.truncf %17 : vector<8x128xf32> to vector<8x128xbf16>
    %c0_6 = arith.constant 0 : index
    %c0_7 = arith.constant 0 : index
    %c0_8 = arith.constant 0 : index
    %19 = vector.load %arg4[%c0_6, %c0_7, %c0_8] : memref<2x128x128xbf16, #tpu.memory_space<vmem>>, vector<1x128x128xbf16>
    %20 = vector.shape_cast %19 : vector<1x128x128xbf16> to vector<128x128xbf16>
    %cst_9 = arith.constant dense<0.000000e+00> : vector<8x128xf32>
    %21 = tpu.matmul %18, %20, %cst_9 {dimension_numbers = #tpu.dot_dimension_numbers<[1], [0], [0], [1], [0, 0, 1, 1], [], []>} : vector<8x128xbf16>, vector<128x128xbf16>, vector<8x128xf32> -> vector<8x128xf32>
    %c0_10 = arith.constant 0 : index
    %c0_11 = arith.constant 0 : index
    %c0_12 = arith.constant 0 : index
    %22 = vector.load %arg5[%c0_10, %c0_11, %c0_12] : memref<2x1x128xf32, #tpu.memory_space<vmem>>, vector<1x1x128xf32>
    %23 = vector.shape_cast %22 : vector<1x1x128xf32> to vector<1x128xf32>
    %24 = vector.broadcast %23 : vector<1x128xf32> to vector<8x128xf32>
    %25 = arith.addf %21, %24 : vector<8x128xf32>
    %cst_13 = arith.constant 0.00999999977 : f32
    %26 = vector.broadcast %cst_13 : f32 to vector<8x128xf32>
    %27 = arith.mulf %26, %25 : vector<8x128xf32>
    %28 = arith.maximumf %25, %27 : vector<8x128xf32>
    %29 = arith.truncf %28 : vector<8x128xf32> to vector<8x128xbf16>
    %c1_14 = arith.constant 1 : index
    %c0_15 = arith.constant 0 : index
    %c0_16 = arith.constant 0 : index
    %30 = vector.load %arg4[%c1_14, %c0_15, %c0_16] : memref<2x128x128xbf16, #tpu.memory_space<vmem>>, vector<1x128x128xbf16>
    %31 = vector.shape_cast %30 : vector<1x128x128xbf16> to vector<128x128xbf16>
    %cst_17 = arith.constant dense<0.000000e+00> : vector<8x128xf32>
    %32 = tpu.matmul %29, %31, %cst_17 {dimension_numbers = #tpu.dot_dimension_numbers<[1], [0], [0], [1], [0, 0, 1, 1], [], []>} : vector<8x128xbf16>, vector<128x128xbf16>, vector<8x128xf32> -> vector<8x128xf32>
    %c1_18 = arith.constant 1 : index
    %c0_19 = arith.constant 0 : index
    %c0_20 = arith.constant 0 : index
    %33 = vector.load %arg5[%c1_18, %c0_19, %c0_20] : memref<2x1x128xf32, #tpu.memory_space<vmem>>, vector<1x1x128xf32>
    %34 = vector.shape_cast %33 : vector<1x1x128xf32> to vector<1x128xf32>
    %35 = vector.broadcast %34 : vector<1x128xf32> to vector<8x128xf32>
    %36 = arith.addf %32, %35 : vector<8x128xf32>
    %cst_21 = arith.constant 0.00999999977 : f32
    %37 = vector.broadcast %cst_21 : f32 to vector<8x128xf32>
    %38 = arith.mulf %37, %36 : vector<8x128xf32>
    %39 = arith.maximumf %36, %38 : vector<8x128xf32>
    %40 = arith.truncf %39 : vector<8x128xf32> to vector<8x128xbf16>
    %c0_22 = arith.constant 0 : index
    %c0_23 = arith.constant 0 : index
    %41 = vector.load %arg6[%c0_22, %c0_23] : memref<128x4xbf16, #tpu.memory_space<vmem>>, vector<128x4xbf16>
    %cst_24 = arith.constant dense<0.000000e+00> : vector<8x4xf32>
    %42 = tpu.matmul %40, %41, %cst_24 {dimension_numbers = #tpu.dot_dimension_numbers<[1], [0], [0], [1], [0, 0, 1, 1], [], []>} : vector<8x128xbf16>, vector<128x4xbf16>, vector<8x4xf32> -> vector<8x4xf32>
    %c0_25 = arith.constant 0 : index
    %c0_26 = arith.constant 0 : index
    %43 = vector.load %arg7[%c0_25, %c0_26] : memref<1x4xf32, #tpu.memory_space<vmem>>, vector<1x4xf32>
    %44 = vector.broadcast %43 : vector<1x4xf32> to vector<8x4xf32>
    %45 = arith.addf %42, %44 : vector<8x4xf32>
    %46 = vector.extract_strided_slice %45 {offsets = [0, 0], sizes = [8, 2], strides = [1, 1]} : vector<8x4xf32> to vector<8x2xf32>
    %c0_27 = arith.constant 0 : index
    %c0_28 = arith.constant 0 : index
    %47 = vector.load %arg8[%c0_27, %c0_28] : memref<8x2xf32, #tpu.memory_space<vmem>>, vector<8x2xf32>
    tpu.vector_store %arg8[%c0_27, %c0_28], %46 {strides = array<i32>} : memref<8x2xf32, #tpu.memory_space<vmem>>, vector<8x2xf32>,
    %48 = vector.extract_strided_slice %45 {offsets = [0, 2], sizes = [8, 2], strides = [1, 1]} : vector<8x4xf32> to vector<8x2xf32>
    %c0_29 = arith.constant 0 : index
    %c0_30 = arith.constant 0 : index
    %49 = vector.load %arg9[%c0_29, %c0_30] : memref<8x2xf32, #tpu.memory_space<vmem>>, vector<8x2xf32>
    tpu.vector_store %arg9[%c0_29, %c0_30], %48 {strides = array<i32>} : memref<8x2xf32, #tpu.memory_space<vmem>>, vector<8x2xf32>,
    return
  }
  func.func @transform_0(%arg0: i32) -> (i32, i32) {
    %c0_i32 = arith.constant 0 : i32
    %c0_i32_0 = arith.constant 0 : i32
    return %arg0, %c0_i32 : i32, i32
  }
  func.func @transform_1(%arg0: i32) -> (i32, i32) {
    %c0_i32 = arith.constant 0 : i32
    %c0_i32_0 = arith.constant 0 : i32
    %c0_i32_1 = arith.constant 0 : i32
    return %c0_i32, %c0_i32_0 : i32, i32
  }
  func.func @transform_2(%arg0: i32) -> (i32, i32) {
    %c0_i32 = arith.constant 0 : i32
    %c0_i32_0 = arith.constant 0 : i32
    %c0_i32_1 = arith.constant 0 : i32
    return %c0_i32, %c0_i32_0 : i32, i32
  }
  func.func @transform_3(%arg0: i32) -> (i32, i32, i32) {
    %c0_i32 = arith.constant 0 : i32
    %c0_i32_0 = arith.constant 0 : i32
    %c0_i32_1 = arith.constant 0 : i32
    %c0_i32_2 = arith.constant 0 : i32
    return %c0_i32, %c0_i32_0, %c0_i32_1 : i32, i32, i32
  }
  func.func @transform_4(%arg0: i32) -> (i32, i32, i32) {
    %c0_i32 = arith.constant 0 : i32
    %c0_i32_0 = arith.constant 0 : i32
    %c0_i32_1 = arith.constant 0 : i32
    %c0_i32_2 = arith.constant 0 : i32
    return %c0_i32, %c0_i32_0, %c0_i32_1 : i32, i32, i32
  }
  func.func @transform_5(%arg0: i32) -> (i32, i32) {
    %c0_i32 = arith.constant 0 : i32
    %c0_i32_0 = arith.constant 0 : i32
    %c0_i32_1 = arith.constant 0 : i32
    return %c0_i32, %c0_i32_0 : i32, i32
  }
  func.func @transform_6(%arg0: i32) -> (i32, i32) {
    %c0_i32 = arith.constant 0 : i32
    %c0_i32_0 = arith.constant 0 : i32
    %c0_i32_1 = arith.constant 0 : i32
    return %c0_i32, %c0_i32_0 : i32, i32
  }
  func.func @transform_7(%arg0: i32) -> (i32, i32) {
    %c0_i32 = arith.constant 0 : i32
    %c0_i32_0 = arith.constant 0 : i32
    return %arg0, %c0_i32 : i32, i32
  }
  func.func @transform_8(%arg0: i32) -> (i32, i32) {
    %c0_i32 = arith.constant 0 : i32
    %c0_i32_0 = arith.constant 0 : i32
    return %arg0, %c0_i32 : i32, i32
  }
}

</mosaic_0001>

<bundles_post_ra>
// kernel: tpu_custom_call.1
= control target key start
LH: loop header
LB: loop body
LE: loop exit
PB: predicated region body
PF: predicated region fallthrough
CT: control target
= control target key end

     0   :  { %14 = vsyncpa [#allocation3], 0  ;;  %s608_s27 = smov [#allocation2]   ;;  %s745_s0 = inlined_call_operand.vmem [shape: f32[8,2], index: 0, kind: input, shape index: {}]   ;;  %s746_s1 = inlined_call_operand.vmem [shape: f32[2,128], index: 1, kind: input, shape index: {}]   ;;  %s747_s2 = inlined_call_operand.vmem [shape: f32[1,128], index: 2, kind: input, shape index: {}]   ;;  %s748_s3 = inlined_call_operand.hbm [shape: bf16[2,128,128], index: 3, kind: input, shape index: {}]   ;;  %s749_s4 = inlined_call_operand.vmem [shape: f32[2,1,128], index: 4, kind: input, shape index: {}]   ;;  %s750_s5 = inlined_call_operand.vmem [shape: bf16[128,4], index: 5, kind: input, shape index: {}]   ;;  %s751_s6 = inlined_call_operand.vmem [shape: f32[1,4], index: 6, kind: input, shape index: {}]   ;;  %s752_s7 = inlined_call_operand.vmem [shape: f32[8,2], index: 7, kind: output, shape index: {0}]   ;;  %s753_s8 = inlined_call_operand.vmem [shape: f32[8,2], index: 8, kind: output, shape index: {1}]  }
   0x1   :  { %s26_s28 = sshll.u32 %s608_s27, 4  ;;  %s27_s28 = int_to_ptr.vmem [resolvable:$true] %s26_s28 }
   0x2   :  { %s594_s29 = scalar_lea.vmem %s27_s28, 2048  ;;  %p599_p1 = scmp.lt.s32.totalorder %s27_s28, %s27_s28 }
   0x3   :  { %p595_p0 = scmp.ne.s32.totalorder %s27_s28, %s594_s29  ;;  %p600_p2 = scmp.lt.s32.totalorder %s594_s29, %s594_s29 }
   0x5   :  { %p601_p3 = por %p600_p2, %p599_p1 }
   0x7   :  { %p602_p4 = pnand %p601_p3, %p595_p0 }
   0x9   :  { %605 = shalt.err (!%p602_p4)
}
   0xa   :  { %s609_s30 = smov 64   ;;  %s610_s9 = smov 4  }
   0xb   :  { %32 = dma.hbm_to_vmem [thread:$0]  %s748_s3, 2048, %s27_s28, [#allocation3], %s609_s30, %s609_s30, %s610_s9  }
   0xc   :  { %606 = dma.done.wait [#allocation3], 2048  }
   0xd   :  { %607 = vsyncadd [#allocation3], 4294965248  ;;  %v611_v0 = vmov 0   ;;  %v612_v1 = vmov 0.0   ;;  %v43_v2 = vld [vmem:[%s745_s0] sm:$0xff]  ;;  %v562_v3 = vld [vmem:[#allocation2 + $0x38] sm:$0xff]  }
   0xe   :  { %560 = vset.pattern.permute.xlu0 %v611_v0  ;;  %492 = vmatprep.subr.bf16.mxu0 %v612_v1  ;;  %v563_v4 = vld [vmem:[#allocation2 + $0x30] sm:$0xff]   ;;  %v613_v5 = vmov 1   ;;  %v564_v6 = vld [vmem:[#allocation2 + $0x28] sm:$0xff]   ;;  %vm614_vm0 = vmmov 0   ;;  %v565_v7 = vld [vmem:[#allocation2 + $0x20] sm:$0xff]   ;;  %vm418_vm1 = vcmask 15360  }
   0xf   :  { %512 = vmatprep.subr.bf16.mxu1 %v612_v1  ;;  %47 = vperm.xlu0 %560, %v43_v2   ;;  %v570_v8 = vld [vmem:[#allocation2 + $0x78] sm:$0xff]   ;;  %v571_v10 = vld [vmem:[#allocation2 + $0x70] sm:$0xff]   ;;  %v572_v12 = vld [vmem:[#allocation2 + $0x68] sm:$0xff]  }
  0x10   :  { %493 = vmatpush3.bf16.msra.mxu0 %v562_v3  ;;  %508 = vmatprep.mubr.msk.bf16.mxu0 %vm614_vm0, %v612_v1  ;;  %v566_v9 = vld [vmem:[#allocation2 + $0x18] sm:$0xff]   ;;  %v567_v11 = vld [vmem:[#allocation2 + $0x10] sm:$0xff]   ;;  %v568_v13 = vld [vmem:[#allocation2 + $0x8] sm:$0xff]  }
  0x11   :  { %494 = vmatprep.subr.bf16.mxu0 %v612_v1  ;;  %528 = vmatprep.mubr.msk.bf16.mxu1 %vm614_vm0, %v612_v1  ;;  %v573_v14 = vld [vmem:[#allocation2 + $0x60] sm:$0xff]   ;;  %v574_v16 = vld [vmem:[#allocation2 + $0x58] sm:$0xff]   ;;  %v575_v17 = vld [vmem:[#allocation2 + $0x50] sm:$0xff]  }
  0x12   :  { %513 = vmatpush3.bf16.msra.mxu1 %v570_v8  ;;  %v569_v15 = vld [vmem:[#allocation2] sm:$0xff]   ;;  %v576_v30 = vld [vmem:[#allocation2 + $0x48] sm:$0xff]   ;;  %v578_v32 = vld [vmem:[%s750_s5 + $0x38] sm:$0xff]  }
  0x13   :  { %561 = vset.pattern.permute.xlu0 %v613_v5  ;;  %514 = vmatprep.subr.bf16.mxu1 %v612_v1  ;;  %v434_v19 = vld [vmem:[%s746_s1] ss:$0 sm:$0xff]  ;;  %v435_v20 = vld [vmem:[%s746_s1 + $0x1] ss:$0 sm:$0xff]  ;;  %v579_v33 = vld [vmem:[%s750_s5 + $0x30] sm:$0xff]  }
  0x14   :  { %57 = vperm.xlu0 %561, %v43_v2   ;;  %495 = vmatpush3.bf16.msra.mxu0 %v563_v4  ;;  %v436_v24 = vld [vmem:[%s747_s2] ss:$0 sm:$0xff]  ;;  %v580_v34 = vld [vmem:[%s750_s5 + $0x28] sm:$0xff]   ;;  %v582_v36 = vld [vmem:[%s750_s5 + $0x18] sm:$0xff]  }
  0x15   :  { %496 = vmatprep.subr.bf16.mxu0 %v612_v1  ;;  %v577_v31 = vld [vmem:[#allocation2 + $0x40] sm:$0xff]   ;;  %v583_v37 = vld [vmem:[%s750_s5 + $0x10] sm:$0xff]   ;;  %v584_v47 = vld [vmem:[%s750_s5 + $0x8] sm:$0xff]  }
  0x16   :  { %515 = vmatpush3.bf16.msra.mxu1 %v571_v10  ;;  %v581_v35 = vld [vmem:[%s750_s5 + $0x20] sm:$0xff]  }
  0x17   :  { %516 = vmatprep.subr.bf16.mxu1 %v612_v1  ;;  %v437_v38 = vld [vmem:[%s749_s4] ss:$0 sm:$0xff]  ;;  %v447_v49 = vld [vmem:[%s749_s4 + $0x1] ss:$0 sm:$0xff] }
  0x18   :  { %497 = vmatpush3.bf16.msra.mxu0 %v564_v6  ;;  %v585_v48 = vld [vmem:[%s750_s5] sm:$0xff]   ;;  %s615_s5 = smov 126  }
  0x19   :  { %498 = vmatprep.subr.bf16.mxu0 %v612_v1  ;;  %v456_v58 = vld [vmem:[%s751_s6] ss:$0 sm:$0xff] }
  0x1a   :  { %517 = vmatpush3.bf16.msra.mxu1 %v572_v12 }
  0x1b   :  { %518 = vmatprep.subr.bf16.mxu1 %v612_v1 }
  0x1c   :  { %499 = vmatpush3.bf16.msra.mxu0 %v565_v7 }
  0x1d   :  { %500 = vmatprep.subr.bf16.mxu0 %v612_v1 }
  0x1e   :  { %519 = vmatpush3.bf16.msra.mxu1 %v573_v14 }
  0x1f   :  { %520 = vmatprep.subr.bf16.mxu1 %v612_v1 }
  0x20   :  { %501 = vmatpush3.bf16.msra.mxu0 %v566_v9 }
  0x21   :  { %502 = vmatprep.subr.bf16.mxu0 %v612_v1 }
  0x22   :  { %521 = vmatpush3.bf16.msra.mxu1 %v574_v16 }
  0x23   :  { %522 = vmatprep.subr.bf16.mxu1 %v612_v1 }
  0x24   :  { %503 = vmatpush3.bf16.msra.mxu0 %v567_v11 }
  0x25   :  { %504 = vmatprep.subr.bf16.mxu0 %v612_v1 }
  0x26   :  { %523 = vmatpush3.bf16.msra.mxu1 %v575_v17 }
  0x27   :  { %524 = vmatprep.subr.bf16.mxu1 %v612_v1 }
  0x28   :  { %505 = vmatpush3.bf16.msra.mxu0 %v568_v13 }
  0x29   :  { %506 = vmatprep.subr.bf16.mxu0 %v612_v1 }
  0x2a   :  { %525 = vmatpush3.bf16.msra.mxu1 %v576_v30 }
  0x2b   :  { %526 = vmatprep.subr.bf16.mxu1 %v612_v1 }
  0x2c   :  { %507 = vmatpush3.bf16.msra.mxu0 %v569_v15 }
  0x2d   :  { %532 = vmatprep.subr.bf16.mxu0 %v612_v1 }
  0x2e   :  { %527 = vmatpush3.bf16.msra.mxu1 %v577_v31 }
  0x8a   :  { %v48_v18 = vpop.permute.xlu0 %47 }
  0x8b   :  { %v54_v22 = vmul.f32 %v434_v19, %v48_v18 }
  0x8f   :  { %v58_v21 = vpop.permute.xlu0 %57 }
  0x90   :  { %v64_v23 = vmul.f32 %v435_v20, %v58_v21 }
  0x92   :  { %v65_v25 = vadd.f32 %v64_v23, %v54_v22 }
  0x94   :  { %v73_v26 = vadd.f32 %v436_v24, %v65_v25 }
  0x96   :  { %v74_v27 = vmul.f32 0.01, %v73_v26 }
  0x98   :  { %v75_v28 = vmax.f32 %v73_v26, %v74_v27 }
  0x9a   :  { %v76_v29 = vpack.c.bf16 %v75_v28, %v75_v28 }
  0x9c   :  { %509 = vmatmul.mubr.bf16.vlgmr.msra.gmra.mxu0 %v76_v29 }
  0x9d   :  { %548 = vmatprep.mubr.msk.bf16.mxu0 %vm614_vm0, %v612_v1  ;;  %533 = vmatpush3.bf16.msra.mxu0 %v578_v32 }
  0x9e   :  { %534 = vmatprep.subr.bf16.mxu0 %v612_v1 }
  0xa1   :  { %535 = vmatpush3.bf16.msra.mxu0 %v579_v33 }
  0xa2   :  { %536 = vmatprep.subr.bf16.mxu0 %v612_v1 }
  0xa5   :  { %537 = vmatpush3.bf16.msra.mxu0 %v580_v34 }
  0xa6   :  { %538 = vmatprep.subr.bf16.mxu0 %v612_v1 }
  0xa9   :  { %539 = vmatpush3.bf16.msra.mxu0 %v581_v35 }
  0xaa   :  { %540 = vmatprep.subr.bf16.mxu0 %v612_v1 }
  0xad   :  { %541 = vmatpush3.bf16.msra.mxu0 %v582_v36 }
  0xae   :  { %542 = vmatprep.subr.bf16.mxu0 %v612_v1 }
  0xb1   :  { %543 = vmatpush3.bf16.msra.mxu0 %v583_v37 }
  0xb2   :  { %544 = vmatprep.subr.bf16.mxu0 %v612_v1 }
  0xb5   :  { %545 = vmatpush3.bf16.msra.mxu0 %v584_v47 }
  0xb6   :  { %546 = vmatprep.subr.bf16.mxu0 %v612_v1 }
  0xb9   :  { %547 = vmatpush3.bf16.msra.mxu0 %v585_v48 }
 0x15c   :  { %v182_v39 = vpop.f32.mrf.mxu0 }
 0x15d   :  { %v183_v40 = vadd.f32 %v437_v38, %v182_v39 }
 0x15e   :  { %v510_v41 = vpop.f32.mrf.mxu0 }
 0x15f   :  { %v188_v42 = vmul.f32 0.01, %v183_v40 }
 0x160   :  { %v185_v43 = vpop.f32.mrf.mxu0 }
 0x161   :  { %v189_v44 = vmax.f32 %v183_v40, %v188_v42 }
 0x162   :  { %v511_v45 = vpop.f32.mrf.mxu0 }
 0x163   :  { %v190_v46 = vpack.c.bf16 %v189_v44, %v189_v44 }
 0x165   :  { %529 = vmatmul.mubr.bf16.vlgmr.msra.gmra.mxu1 %v190_v46 }
 0x225   :  { %v298_v50 = vpop.f32.mrf.mxu1 }
 0x226   :  { %v299_v51 = vadd.f32 %v447_v49, %v298_v50 }
 0x227   :  { %v530_v52 = vpop.f32.mrf.mxu1 }
 0x228   :  { %v304_v53 = vmul.f32 0.01, %v299_v51 }
 0x229   :  { %v301_v54 = vpop.f32.mrf.mxu1 }
 0x22a   :  { %v305_v55 = vmax.f32 %v299_v51, %v304_v53 }
 0x22b   :  { %v531_v56 = vpop.f32.mrf.mxu1 }
 0x22c   :  { %v306_v57 = vpack.c.bf16 %v305_v55, %v305_v55 }
 0x22e   :  { %549 = vmatmul.mubr.bf16.vlgmr.msra.gmra.mxu0 %v306_v57 }
 0x2ee   :  { %v412_v59 = vpop.f32.mrf.mxu0 }
 0x2ef   :  { %v413_v60 = vadd.f32 %v456_v58, %v412_v59 }
 0x2f0   :  { %v550_v61 = vpop.f32.mrf.mxu0 }
 0x2f1   :  { %421 = vrot.lane.b32.xlu1 %v413_v60, %s615_s5  ;;  %419 = vst.msk [vmem:[%s752_s7] sm:$0xff] %vm418_vm1, %v413_v60 }
 0x2f2   :  { %v415_v62 = vpop.f32.mrf.mxu0 }
 0x2f4   :  { %v551_v63 = vpop.f32.mrf.mxu0 }
 0x363   :  { %v422_v0 = vpop.permute.xlu1 %421 }
 0x364   :  { %424 = vst.msk [vmem:[%s753_s8] sm:$0xff] %vm418_vm1, %v422_v0 }
 0x365   :  { %433 = vsyncpa [#allocation3], 1 }

// kernel: tpu_custom_call.1
= control target key start
LH: loop header
LB: loop body
LE: loop exit
PB: predicated region body
PF: predicated region fallthrough
CT: control target
= control target key end

     0   :  { %14 = vsyncpa [#allocation3], 0  ;;  %s608_s27 = smov [#allocation2]   ;;  %s745_s0 = inlined_call_operand.vmem [shape: f32[8,2], index: 0, kind: input, shape index: {}]   ;;  %s746_s1 = inlined_call_operand.vmem [shape: f32[2,128], index: 1, kind: input, shape index: {}]   ;;  %s747_s2 = inlined_call_operand.vmem [shape: f32[1,128], index: 2, kind: input, shape index: {}]   ;;  %s748_s3 = inlined_call_operand.hbm [shape: bf16[2,128,128], index: 3, kind: input, shape index: {}]   ;;  %s749_s4 = inlined_call_operand.vmem [shape: f32[2,1,128], index: 4, kind: input, shape index: {}]   ;;  %s750_s5 = inlined_call_operand.vmem [shape: bf16[128,4], index: 5, kind: input, shape index: {}]   ;;  %s751_s6 = inlined_call_operand.vmem [shape: f32[1,4], index: 6, kind: input, shape index: {}]   ;;  %s752_s7 = inlined_call_operand.vmem [shape: f32[8,2], index: 7, kind: output, shape index: {0}]   ;;  %s753_s8 = inlined_call_operand.vmem [shape: f32[8,2], index: 8, kind: output, shape index: {1}]  }
   0x1   :  { %s26_s28 = sshll.u32 %s608_s27, 4  ;;  %s27_s28 = int_to_ptr.vmem [resolvable:$true] %s26_s28 }
   0x2   :  { %s594_s29 = scalar_lea.vmem %s27_s28, 2048  ;;  %p599_p1 = scmp.lt.s32.totalorder %s27_s28, %s27_s28 }
   0x3   :  { %p595_p0 = scmp.ne.s32.totalorder %s27_s28, %s594_s29  ;;  %p600_p2 = scmp.lt.s32.totalorder %s594_s29, %s594_s29 }
   0x5   :  { %p601_p3 = por %p600_p2, %p599_p1 }
   0x7   :  { %p602_p4 = pnand %p601_p3, %p595_p0 }
   0x9   :  { %605 = shalt.err (!%p602_p4)
}
   0xa   :  { %s609_s30 = smov 64   ;;  %s610_s9 = smov 4  }
   0xb   :  { %32 = dma.hbm_to_vmem [thread:$0]  %s748_s3, 2048, %s27_s28, [#allocation3], %s609_s30, %s609_s30, %s610_s9  }
   0xc   :  { %606 = dma.done.wait [#allocation3], 2048  }
   0xd   :  { %607 = vsyncadd [#allocation3], 4294965248  ;;  %v611_v0 = vmov 0   ;;  %v612_v1 = vmov 0.0   ;;  %v43_v2 = vld [vmem:[%s745_s0] sm:$0xff]  ;;  %v562_v3 = vld [vmem:[#allocation2 + $0x38] sm:$0xff]  }
   0xe   :  { %560 = vset.pattern.permute.xlu0 %v611_v0  ;;  %492 = vmatprep.subr.bf16.mxu0 %v612_v1  ;;  %v563_v4 = vld [vmem:[#allocation2 + $0x30] sm:$0xff]   ;;  %v613_v5 = vmov 1   ;;  %v564_v6 = vld [vmem:[#allocation2 + $0x28] sm:$0xff]   ;;  %vm614_vm0 = vmmov 0   ;;  %v565_v7 = vld [vmem:[#allocation2 + $0x20] sm:$0xff]   ;;  %vm418_vm1 = vcmask 15360  }
   0xf   :  { %512 = vmatprep.subr.bf16.mxu1 %v612_v1  ;;  %47 = vperm.xlu0 %560, %v43_v2   ;;  %v570_v8 = vld [vmem:[#allocation2 + $0x78] sm:$0xff]   ;;  %v571_v10 = vld [vmem:[#allocation2 + $0x70] sm:$0xff]   ;;  %v572_v12 = vld [vmem:[#allocation2 + $0x68] sm:$0xff]  }
  0x10   :  { %493 = vmatpush3.bf16.msra.mxu0 %v562_v3  ;;  %508 = vmatprep.mubr.msk.bf16.mxu0 %vm614_vm0, %v612_v1  ;;  %v566_v9 = vld [vmem:[#allocation2 + $0x18] sm:$0xff]   ;;  %v567_v11 = vld [vmem:[#allocation2 + $0x10] sm:$0xff]   ;;  %v568_v13 = vld [vmem:[#allocation2 + $0x8] sm:$0xff]  }
  0x11   :  { %494 = vmatprep.subr.bf16.mxu0 %v612_v1  ;;  %528 = vmatprep.mubr.msk.bf16.mxu1 %vm614_vm0, %v612_v1  ;;  %v573_v14 = vld [vmem:[#allocation2 + $0x60] sm:$0xff]   ;;  %v574_v16 = vld [vmem:[#allocation2 + $0x58] sm:$0xff]   ;;  %v575_v17 = vld [vmem:[#allocation2 + $0x50] sm:$0xff]  }
  0x12   :  { %513 = vmatpush3.bf16.msra.mxu1 %v570_v8  ;;  %v569_v15 = vld [vmem:[#allocation2] sm:$0xff]   ;;  %v576_v30 = vld [vmem:[#allocation2 + $0x48] sm:$0xff]   ;;  %v578_v32 = vld [vmem:[%s750_s5 + $0x38] sm:$0xff]  }
  0x13   :  { %561 = vset.pattern.permute.xlu0 %v613_v5  ;;  %514 = vmatprep.subr.bf16.mxu1 %v612_v1  ;;  %v434_v19 = vld [vmem:[%s746_s1] ss:$0 sm:$0xff]  ;;  %v435_v20 = vld [vmem:[%s746_s1 + $0x1] ss:$0 sm:$0xff]  ;;  %v579_v33 = vld [vmem:[%s750_s5 + $0x30] sm:$0xff]  }
  0x14   :  { %57 = vperm.xlu0 %561, %v43_v2   ;;  %495 = vmatpush3.bf16.msra.mxu0 %v563_v4  ;;  %v436_v24 = vld [vmem:[%s747_s2] ss:$0 sm:$0xff]  ;;  %v580_v34 = vld [vmem:[%s750_s5 + $0x28] sm:$0xff]   ;;  %v582_v36 = vld [vmem:[%s750_s5 + $0x18] sm:$0xff]  }
  0x15   :  { %496 = vmatprep.subr.bf16.mxu0 %v612_v1  ;;  %v577_v31 = vld [vmem:[#allocation2 + $0x40] sm:$0xff]   ;;  %v583_v37 = vld [vmem:[%s750_s5 + $0x10] sm:$0xff]   ;;  %v584_v47 = vld [vmem:[%s750_s5 + $0x8] sm:$0xff]  }
  0x16   :  { %515 = vmatpush3.bf16.msra.mxu1 %v571_v10  ;;  %v581_v35 = vld [vmem:[%s750_s5 + $0x20] sm:$0xff]  }
  0x17   :  { %516 = vmatprep.subr.bf16.mxu1 %v612_v1  ;;  %v437_v38 = vld [vmem:[%s749_s4] ss:$0 sm:$0xff]  ;;  %v447_v49 = vld [vmem:[%s749_s4 + $0x1] ss:$0 sm:$0xff] }
  0x18   :  { %497 = vmatpush3.bf16.msra.mxu0 %v564_v6  ;;  %v585_v48 = vld [vmem:[%s750_s5] sm:$0xff]   ;;  %s615_s5 = smov 126  }
  0x19   :  { %498 = vmatprep.subr.bf16.mxu0 %v612_v1  ;;  %v456_v58 = vld [vmem:[%s751_s6] ss:$0 sm:$0xff] }
  0x1a   :  { %517 = vmatpush3.bf16.msra.mxu1 %v572_v12 }
  0x1b   :  { %518 = vmatprep.subr.bf16.mxu1 %v612_v1 }
  0x1c   :  { %499 = vmatpush3.bf16.msra.mxu0 %v565_v7 }
  0x1d   :  { %500 = vmatprep.subr.bf16.mxu0 %v612_v1 }
  0x1e   :  { %519 = vmatpush3.bf16.msra.mxu1 %v573_v14 }
  0x1f   :  { %520 = vmatprep.subr.bf16.mxu1 %v612_v1 }
  0x20   :  { %501 = vmatpush3.bf16.msra.mxu0 %v566_v9 }
  0x21   :  { %502 = vmatprep.subr.bf16.mxu0 %v612_v1 }
  0x22   :  { %521 = vmatpush3.bf16.msra.mxu1 %v574_v16 }
  0x23   :  { %522 = vmatprep.subr.bf16.mxu1 %v612_v1 }
  0x24   :  { %503 = vmatpush3.bf16.msra.mxu0 %v567_v11 }
  0x25   :  { %504 = vmatprep.subr.bf16.mxu0 %v612_v1 }
  0x26   :  { %523 = vmatpush3.bf16.msra.mxu1 %v575_v17 }
  0x27   :  { %524 = vmatprep.subr.bf16.mxu1 %v612_v1 }
  0x28   :  { %505 = vmatpush3.bf16.msra.mxu0 %v568_v13 }
  0x29   :  { %506 = vmatprep.subr.bf16.mxu0 %v612_v1 }
  0x2a   :  { %525 = vmatpush3.bf16.msra.mxu1 %v576_v30 }
  0x2b   :  { %526 = vmatprep.subr.bf16.mxu1 %v612_v1 }
  0x2c   :  { %507 = vmatpush3.bf16.msra.mxu0 %v569_v15 }
  0x2d   :  { %532 = vmatprep.subr.bf16.mxu0 %v612_v1 }
  0x2e   :  { %527 = vmatpush3.bf16.msra.mxu1 %v577_v31 }
  0x8a   :  { %v48_v18 = vpop.permute.xlu0 %47 }
  0x8b   :  { %v54_v22 = vmul.f32 %v434_v19, %v48_v18 }
  0x8f   :  { %v58_v21 = vpop.permute.xlu0 %57 }
  0x90   :  { %v64_v23 = vmul.f32 %v435_v20, %v58_v21 }
  0x92   :  { %v65_v25 = vadd.f32 %v64_v23, %v54_v22 }
  0x94   :  { %v73_v26 = vadd.f32 %v436_v24, %v65_v25 }
  0x96   :  { %v74_v27 = vmul.f32 0.01, %v73_v26 }
  0x98   :  { %v75_v28 = vmax.f32 %v73_v26, %v74_v27 }
  0x9a   :  { %v76_v29 = vpack.c.bf16 %v75_v28, %v75_v28 }
  0x9c   :  { %509 = vmatmul.mubr.bf16.vlgmr.msra.gmra.mxu0 %v76_v29 }
  0x9d   :  { %548 = vmatprep.mubr.msk.bf16.mxu0 %vm614_vm0, %v612_v1  ;;  %533 = vmatpush3.bf16.msra.mxu0 %v578_v32 }
  0x9e   :  { %534 = vmatprep.subr.bf16.mxu0 %v612_v1 }
  0xa1   :  { %535 = vmatpush3.bf16.msra.mxu0 %v579_v33 }
  0xa2   :  { %536 = vmatprep.subr.bf16.mxu0 %v612_v1 }
  0xa5   :  { %537 = vmatpush3.bf16.msra.mxu0 %v580_v34 }
  0xa6   :  { %538 = vmatprep.subr.bf16.mxu0 %v612_v1 }
  0xa9   :  { %539 = vmatpush3.bf16.msra.mxu0 %v581_v35 }
  0xaa   :  { %540 = vmatprep.subr.bf16.mxu0 %v612_v1 }
  0xad   :  { %541 = vmatpush3.bf16.msra.mxu0 %v582_v36 }
  0xae   :  { %542 = vmatprep.subr.bf16.mxu0 %v612_v1 }
  0xb1   :  { %543 = vmatpush3.bf16.msra.mxu0 %v583_v37 }
  0xb2   :  { %544 = vmatprep.subr.bf16.mxu0 %v612_v1 }
  0xb5   :  { %545 = vmatpush3.bf16.msra.mxu0 %v584_v47 }
  0xb6   :  { %546 = vmatprep.subr.bf16.mxu0 %v612_v1 }
  0xb9   :  { %547 = vmatpush3.bf16.msra.mxu0 %v585_v48 }
 0x15c   :  { %v182_v39 = vpop.f32.mrf.mxu0 }
 0x15d   :  { %v183_v40 = vadd.f32 %v437_v38, %v182_v39 }
 0x15e   :  { %v510_v41 = vpop.f32.mrf.mxu0 }
 0x15f   :  { %v188_v42 = vmul.f32 0.01, %v183_v40 }
 0x160   :  { %v185_v43 = vpop.f32.mrf.mxu0 }
 0x161   :  { %v189_v44 = vmax.f32 %v183_v40, %v188_v42 }
 0x162   :  { %v511_v45 = vpop.f32.mrf.mxu0 }
 0x163   :  { %v190_v46 = vpack.c.bf16 %v189_v44, %v189_v44 }
 0x165   :  { %529 = vmatmul.mubr.bf16.vlgmr.msra.gmra.mxu1 %v190_v46 }
 0x225   :  { %v298_v50 = vpop.f32.mrf.mxu1 }
 0x226   :  { %v299_v51 = vadd.f32 %v447_v49, %v298_v50 }
 0x227   :  { %v530_v52 = vpop.f32.mrf.mxu1 }
 0x228   :  { %v304_v53 = vmul.f32 0.01, %v299_v51 }
 0x229   :  { %v301_v54 = vpop.f32.mrf.mxu1 }
 0x22a   :  { %v305_v55 = vmax.f32 %v299_v51, %v304_v53 }
 0x22b   :  { %v531_v56 = vpop.f32.mrf.mxu1 }
 0x22c   :  { %v306_v57 = vpack.c.bf16 %v305_v55, %v305_v55 }
 0x22e   :  { %549 = vmatmul.mubr.bf16.vlgmr.msra.gmra.mxu0 %v306_v57 }
 0x2ee   :  { %v412_v59 = vpop.f32.mrf.mxu0 }
 0x2ef   :  { %v413_v60 = vadd.f32 %v456_v58, %v412_v59 }
 0x2f0   :  { %v550_v61 = vpop.f32.mrf.mxu0 }
 0x2f1   :  { %421 = vrot.lane.b32.xlu1 %v413_v60, %s615_s5  ;;  %419 = vst.msk [vmem:[%s752_s7] sm:$0xff] %vm418_vm1, %v413_v60 }
 0x2f2   :  { %v415_v62 = vpop.f32.mrf.mxu0 }
 0x2f4   :  { %v551_v63 = vpop.f32.mrf.mxu0 }
 0x363   :  { %v422_v0 = vpop.permute.xlu1 %421 }
 0x364   :  { %424 = vst.msk [vmem:[%s753_s8] sm:$0xff] %vm418_vm1, %v422_v0 }
 0x365   :  { %433 = vsyncpa [#allocation3], 1 }

</bundles_post_ra>
